<compile_context>
chip_gen: v5e
topology: v5e:2x2
jax: 0.10.0
libtpu: 0.0.40
codegen_flags: <defaults>
</compile_context>

<pallas_src>
import jax
import jax.numpy as jnp
from jax.experimental import pallas as pl
from jax.experimental.pallas import tpu as pltpu


def _attn_kernel(x_ref, phi_ref, g_ref, wt_ref, wo_ref, gamma_ref, o_ref):
    """One (image, query-tile) grid step of the attention phase.

    x_ref    : (1, C, TQ)    f32   query tile, channel-major, spatial order
    phi_ref  : (1, C8, HW4)  bf16  pooled phi for this image
    g_ref    : (1, C2, HW4)  bf16  pooled g for this image
    wt_ref   : (C8, C)       bf16  theta 1x1-conv weight (spectrally normalized)
    wo_ref   : (C, C2)       bf16  output 1x1-conv weight
    gamma_ref: (1,)          f32   in SMEM
    o_ref    : (1, C, TQ)    f32
    """
    x = x_ref[0]                                                   # (C, TQ) f32
    xb = x.astype(jnp.bfloat16)

    theta = jnp.dot(wt_ref[...], xb,
                    preferred_element_type=jnp.float32)            # (C8, TQ) f32

    # s[k, q] = sum_c phi[c, k] * theta[c, q]  -- transposed logits: keys on
    # sublanes, queries on lanes, so softmax stats come out as (1, TQ) rows.
    s = jax.lax.dot_general(phi_ref[0], theta.astype(jnp.bfloat16),
                            (((0,), (0,)), ((), ())),
                            preferred_element_type=jnp.float32)    # (HW4, TQ)
    s = s - jnp.max(s, axis=0, keepdims=True)
    e = jnp.exp(s)                                                 # (HW4, TQ)
    denom = jnp.sum(e, axis=0, keepdims=True)                      # (1, TQ)

    # Deferred softmax normalization: value-matmul the *unnormalized* exp,
    # then scale the small (C2, TQ) result by the per-query reciprocal (EUP).
    av = jnp.dot(g_ref[0], e.astype(jnp.bfloat16),
                 preferred_element_type=jnp.float32)               # (C2, TQ)
    av = av * pl.reciprocal(denom, approx=True)

    o = jnp.dot(wo_ref[...], av.astype(jnp.bfloat16),
                preferred_element_type=jnp.float32)                # (C, TQ)
    o_ref[0] = (gamma_ref[0] * o + x).astype(o_ref.dtype)


def sn_self_attention_2d(x, w_theta, w_phi, w_g, w_o, gamma, *, q_block=None):
    """x: (N, C, H, W) f32. Weights are the (already spectrally normalized)
    1x1-conv matrices: w_theta/w_phi (C//8, C), w_g (C//2, C), w_o (C, C//2)."""
    N, C, H, W = x.shape
    assert C % 8 == 0 and H % 2 == 0 and W % 2 == 0
    HW = H * W
    HW4 = HW // 4
    C8, C2 = C // 8, C // 2
    CP = C8 + C2

    # ---- lane-dense query tile (multiple of 128); guard the HW fallback ----
    if q_block is None:
        q_block = 0
        for cand in (512, 256, 128):
            if HW % cand == 0:
                q_block = cand
                break
        if q_block == 0:
            # Tiny feature maps only: bound the (HW4, HW) softmax intermediate.
            assert HW <= 2048, "HW must be a multiple of 128 for large feature maps"
            q_block = HW
    else:
        assert HW % q_block == 0 and (q_block % 128 == 0 or q_block == HW)

    cdt = jnp.bfloat16

    # Channel-major flat view: contiguous reshape, no transpose; HW on lanes.
    x_flat = x.reshape(N, C, HW)
    # Window-position-grouped copy (bf16) for the pooled phi/g branches:
    #   x_win[n, p, c, q] = x[n, c, 2i + a, 2j + b],  p = 2a + b, q = i*(W//2) + j
    x_win = (x.reshape(N, C, H // 2, 2, W // 2, 2)
               .transpose(0, 3, 5, 1, 2, 4)
               .reshape(N, 4, C, HW4)).astype(cdt)

    w_pg = jnp.concatenate([w_phi, w_g], axis=0).astype(cdt)       # (CP, C)
    w_t = w_theta.astype(cdt)                                      # (C8, C)
    w_ob = w_o.astype(cdt)                                         # (C, C2)
    gamma_arr = jnp.asarray(gamma, jnp.float32).reshape(1)

    # ---- phase 1: fused phi/g 1x1 conv + 2x2 max-pool (small separate call) ----
    def _pool_kernel(xw_ref, wpg_ref, phi_ref, g_ref, acc_ref):
        # Grid axis 1 walks the four 2x2-window positions; the running max is
        # kept in f32 scratch and written (bf16) on the last step.
        p = pl.program_id(1)
        prod = jnp.dot(wpg_ref[...], xw_ref[0, 0],
                       preferred_element_type=jnp.float32)         # (CP, HW4)

        @pl.when(p == 0)
        def _():
            acc_ref[...] = prod

        @pl.when(p > 0)
        def _():
            acc_ref[...] = jnp.maximum(acc_ref[...], prod)

        @pl.when(p == pl.num_programs(1) - 1)
        def _():
            phi_ref[0] = acc_ref[pl.ds(0, C8), :].astype(phi_ref.dtype)
            g_ref[0] = acc_ref[pl.ds(C8, C2), :].astype(g_ref.dtype)

    phi_p, g_p = pl.pallas_call(
        _pool_kernel,
        out_shape=(jax.ShapeDtypeStruct((N, C8, HW4), cdt),
                   jax.ShapeDtypeStruct((N, C2, HW4), cdt)),
        grid_spec=pltpu.PrefetchScalarGridSpec(
            num_scalar_prefetch=0,
            grid=(N, 4),
            in_specs=[
                pl.BlockSpec((1, 1, C, HW4), lambda n, p: (n, p, 0, 0)),
                pl.BlockSpec((CP, C), lambda n, p: (0, 0)),
            ],
            out_specs=[
                pl.BlockSpec((1, C8, HW4), lambda n, p: (n, 0, 0)),
                pl.BlockSpec((1, C2, HW4), lambda n, p: (n, 0, 0)),
            ],
            scratch_shapes=[pltpu.VMEM((CP, HW4), jnp.float32)],
        ),
        compiler_params=pltpu.CompilerParams(
            dimension_semantics=("parallel", "arbitrary"),
        ),
    )(x_win, w_pg)

    # ---- phase 2: attention over lane-dense query tiles (fully parallel grid) ----
    bytes_f32, bytes_bf16 = 4, 2
    vmem_est = (
        2 * 2 * C * q_block * bytes_f32                  # x tile in + out, double-buffered
        + 2 * 2 * CP * HW4 * bytes_bf16                  # pooled phi+g, double-buffered
        + 2 * (C8 * C + C * C2) * bytes_bf16             # weights, double-buffered
        + (2 * HW4 + C8 + C2 + 2 * C) * q_block * bytes_f32)  # in-kernel temporaries
    vmem_limit = int(min(64 * 1024 * 1024, max(32 * 1024 * 1024, 2 * vmem_est)))

    out_flat = pl.pallas_call(
        _attn_kernel,
        out_shape=jax.ShapeDtypeStruct((N, C, HW), x.dtype),
        grid_spec=pltpu.PrefetchScalarGridSpec(
            num_scalar_prefetch=0,
            grid=(N, HW // q_block),
            in_specs=[
                pl.BlockSpec((1, C, q_block), lambda n, q: (n, 0, q)),
                pl.BlockSpec((1, C8, HW4), lambda n, q: (n, 0, 0)),
                pl.BlockSpec((1, C2, HW4), lambda n, q: (n, 0, 0)),
                pl.BlockSpec((C8, C), lambda n, q: (0, 0)),
                pl.BlockSpec((C, C2), lambda n, q: (0, 0)),
                pl.BlockSpec(memory_space=pltpu.MemorySpace.SMEM),
            ],
            out_specs=pl.BlockSpec((1, C, q_block), lambda n, q: (n, 0, q)),
        ),
        compiler_params=pltpu.CompilerParams(
            dimension_semantics=("parallel", "parallel"),
            vmem_limit_bytes=vmem_limit,
        ),
    )(x_flat, phi_p, g_p, w_t, w_ob, gamma_arr)

    return out_flat.reshape(N, C, H, W)


def _spectral_norm(w, u, n_power_iterations=1, eps=1e-12):
    """PyTorch-style spectral normalization of a 2-D weight (plain-JAX glue)."""
    def _l2n(v):
        return v / (jnp.sqrt(jnp.sum(v * v)) + eps)
    v = None
    for _ in range(n_power_iterations):
        v = _l2n(w.T @ u)
        u = _l2n(w @ v)
    sigma = u @ (w @ v)
    return w / sigma


def _reference(x, w_theta, w_phi, w_g, w_o, gamma):
    """Pure-JAX f32 reference matching the PyTorch forward."""
    N, C, H, W = x.shape
    C8, C2 = C // 8, C // 2
    HW, HW4 = H * W, (H * W) // 4
    hp = jax.lax.Precision.HIGHEST
    theta = jnp.einsum('oc,nchw->nohw', w_theta, x, precision=hp).reshape(N, C8, HW)
    phi = jnp.einsum('oc,nchw->nohw', w_phi, x, precision=hp)
    g = jnp.einsum('oc,nchw->nohw', w_g, x, precision=hp)

    def pool(t):
        n, c, h, w = t.shape
        return jnp.max(t.reshape(n, c, h // 2, 2, w // 2, 2), axis=(3, 5))

    phi = pool(phi).reshape(N, C8, HW4)
    g = pool(g).reshape(N, C2, HW4)
    s = jnp.einsum('ncq,nck->nqk', theta, phi, precision=hp)          # (N, HW, HW4)
    attn = jax.nn.softmax(s, axis=-1)
    av = jnp.einsum('nck,nqk->ncq', g, attn, precision=hp)            # (N, C2, HW)
    o = jnp.einsum('oc,ncq->noq', w_o, av, precision=hp).reshape(N, C, H, W)
    return gamma * o + x


if __name__ == "__main__":
    N, C, H, W = 2, 16, 16, 16
    C8, C2 = C // 8, C // 2

    key = jax.random.PRNGKey(0)
    kx, k1, k2, k3, k4, ku1, ku2, ku3, ku4 = jax.random.split(key, 9)

    x = jax.random.normal(kx, (N, C, H, W), dtype=jnp.float32)

    def init_w(k, o, i):
        return jax.random.normal(k, (o, i), jnp.float32) / jnp.sqrt(i)

    w_theta = _spectral_norm(init_w(k1, C8, C), jax.random.normal(ku1, (C8,), jnp.float32))
    w_phi = _spectral_norm(init_w(k2, C8, C), jax.random.normal(ku2, (C8,), jnp.float32))
    w_g = _spectral_norm(init_w(k3, C2, C), jax.random.normal(ku3, (C2,), jnp.float32))
    w_o = _spectral_norm(init_w(k4, C, C2), jax.random.normal(ku4, (C,), jnp.float32))

    # The module initializes gamma to 0.0 (output == x); use a nonzero value so
    # the attention path actually contributes and is exercised by the check.
    gamma = jnp.float32(0.7)

    out = sn_self_attention_2d(x, w_theta, w_phi, w_g, w_o, gamma)
    out = jax.block_until_ready(out)

    ref = _reference(x, w_theta, w_phi, w_g, w_o, gamma)
    assert out.shape == (N, C, H, W)

    # bf16 MXU operands (f32 accumulation) vs a Precision.HIGHEST f32 reference:
    # check to ~5% of the output scale.
    max_err = float(jnp.max(jnp.abs(out - ref)))
    scale = float(jnp.max(jnp.abs(ref)))
    assert max_err <= 5e-2 * scale + 1e-2, (
        f"mismatch vs reference, max_err={max_err}, scale={scale}")

    print("KERNEL_OK")
</pallas_src>

<mosaic_0001>
module attributes {stable_mosaic.version = 11 : i64} {
  func.func @_pool_kernel(%arg0: i32, %arg1: i32, %arg2: memref<1x1x16x64xbf16, #tpu.memory_space<vmem>>, %arg3: memref<10x16xbf16, #tpu.memory_space<vmem>>, %arg4: memref<1x2x64xbf16, #tpu.memory_space<vmem>>, %arg5: memref<1x8x64xbf16, #tpu.memory_space<vmem>>, %arg6: memref<10x64xf32, #tpu.memory_space<vmem>>) attributes {dimension_semantics = [#tpu.dimension_semantics<parallel>, #tpu.dimension_semantics<arbitrary>], iteration_bounds = array<i64: 2, 4>, scalar_prefetch = 0 : i64, scratch_operands = 1 : i64, tpu.core_type = #tpu.core_type<tc>, window_params = [{transform_indices = @transform_0, window_bounds = array<i64: 1, 1, 16, 64>}, {pipeline_mode = #tpu.pipeline_mode<synchronous>, transform_indices = @transform_1, window_bounds = array<i64: 10, 16>}, {transform_indices = @transform_2, window_bounds = array<i64: 1, 2, 64>}, {transform_indices = @transform_3, window_bounds = array<i64: 1, 8, 64>}]} {
    %c0 = arith.constant 0 : index
    %c0_0 = arith.constant 0 : index
    %0 = vector.load %arg3[%c0, %c0_0] : memref<10x16xbf16, #tpu.memory_space<vmem>>, vector<10x16xbf16>
    %c0_1 = arith.constant 0 : index
    %c0_2 = arith.constant 0 : index
    %c0_3 = arith.constant 0 : index
    %c0_4 = arith.constant 0 : index
    %1 = vector.load %arg2[%c0_1, %c0_2, %c0_3, %c0_4] : memref<1x1x16x64xbf16, #tpu.memory_space<vmem>>, vector<1x1x16x64xbf16>
    %2 = vector.shape_cast %1 : vector<1x1x16x64xbf16> to vector<16x64xbf16>
    %cst = arith.constant dense<0.000000e+00> : vector<10x64xf32>
    %3 = tpu.matmul %0, %2, %cst {dimension_numbers = #tpu.dot_dimension_numbers<[1], [0], [0], [1], [0, 0, 1, 1], [], []>} : vector<10x16xbf16>, vector<16x64xbf16>, vector<10x64xf32> -> vector<10x64xf32>
    %c0_i32 = arith.constant 0 : i32
    %4 = arith.cmpi eq, %arg1, %c0_i32 : i32
    %5 = arith.extui %4 : i1 to i32
    %c0_i32_5 = arith.constant 0 : i32
    %6 = arith.cmpi ne, %5, %c0_i32_5 : i32
    scf.if %6 {
      %c0_9 = arith.constant 0 : index
      %c0_10 = arith.constant 0 : index
      %13 = vector.load %arg6[%c0_9, %c0_10] : memref<10x64xf32, #tpu.memory_space<vmem>>, vector<10x64xf32>
      tpu.vector_store %arg6[%c0_9, %c0_10], %3 {strides = array<i32>} : memref<10x64xf32, #tpu.memory_space<vmem>>, vector<10x64xf32>,
    } else {
    }
    %c0_i32_6 = arith.constant 0 : i32
    %7 = arith.cmpi sgt, %arg1, %c0_i32_6 : i32
    %8 = arith.extui %7 : i1 to i32
    %c0_i32_7 = arith.constant 0 : i32
    %9 = arith.cmpi ne, %8, %c0_i32_7 : i32
    scf.if %9 {
      %c0_9 = arith.constant 0 : index
      %c0_10 = arith.constant 0 : index
      %13 = vector.load %arg6[%c0_9, %c0_10] : memref<10x64xf32, #tpu.memory_space<vmem>>, vector<10x64xf32>
      %14 = arith.maximumf %13, %3 : vector<10x64xf32>
      %c0_11 = arith.constant 0 : index
      %c0_12 = arith.constant 0 : index
      %15 = vector.load %arg6[%c0_11, %c0_12] : memref<10x64xf32, #tpu.memory_space<vmem>>, vector<10x64xf32>
      tpu.vector_store %arg6[%c0_11, %c0_12], %14 {strides = array<i32>} : memref<10x64xf32, #tpu.memory_space<vmem>>, vector<10x64xf32>,
    } else {
    }
    %c3_i32 = arith.constant 3 : i32
    %10 = arith.cmpi eq, %arg1, %c3_i32 : i32
    %11 = arith.extui %10 : i1 to i32
    %c0_i32_8 = arith.constant 0 : i32
    %12 = arith.cmpi ne, %11, %c0_i32_8 : i32
    scf.if %12 {
      %c0_9 = arith.constant 0 : index
      %c0_10 = arith.constant 0 : index
      %13 = vector.load %arg6[%c0_9, %c0_10] : memref<10x64xf32, #tpu.memory_space<vmem>>, vector<2x64xf32>
      %14 = arith.truncf %13 : vector<2x64xf32> to vector<2x64xbf16>
      %c0_11 = arith.constant 0 : index
      %c0_12 = arith.constant 0 : index
      %c0_13 = arith.constant 0 : index
      %15 = vector.load %arg4[%c0_11, %c0_12, %c0_13] : memref<1x2x64xbf16, #tpu.memory_space<vmem>>, vector<1x2x64xbf16>
      %16 = vector.shape_cast %15 : vector<1x2x64xbf16> to vector<2x64xbf16>
      %17 = vector.shape_cast %14 : vector<2x64xbf16> to vector<1x2x64xbf16>
      tpu.vector_store %arg4[%c0_11, %c0_12, %c0_13], %17 {strides = array<i32>} : memref<1x2x64xbf16, #tpu.memory_space<vmem>>, vector<1x2x64xbf16>,
      %c2 = arith.constant 2 : index
      %c0_14 = arith.constant 0 : index
      %18 = vector.load %arg6[%c2, %c0_14] : memref<10x64xf32, #tpu.memory_space<vmem>>, vector<8x64xf32>
      %19 = arith.truncf %18 : vector<8x64xf32> to vector<8x64xbf16>
      %c0_15 = arith.constant 0 : index
      %c0_16 = arith.constant 0 : index
      %c0_17 = arith.constant 0 : index
      %20 = vector.load %arg5[%c0_15, %c0_16, %c0_17] : memref<1x8x64xbf16, #tpu.memory_space<vmem>>, vector<1x8x64xbf16>
      %21 = vector.shape_cast %20 : vector<1x8x64xbf16> to vector<8x64xbf16>
      %22 = vector.shape_cast %19 : vector<8x64xbf16> to vector<1x8x64xbf16>
      tpu.vector_store %arg5[%c0_15, %c0_16, %c0_17], %22 {strides = array<i32>} : memref<1x8x64xbf16, #tpu.memory_space<vmem>>, vector<1x8x64xbf16>,
    } else {
    }
    return
  }
  func.func @transform_0(%arg0: i32, %arg1: i32) -> (i32, i32, i32, i32) {
    %c0_i32 = arith.constant 0 : i32
    %c0_i32_0 = arith.constant 0 : i32
    %c0_i32_1 = arith.constant 0 : i32
    return %arg0, %arg1, %c0_i32, %c0_i32_0 : i32, i32, i32, i32
  }
  func.func @transform_1(%arg0: i32, %arg1: i32) -> (i32, i32) {
    %c0_i32 = arith.constant 0 : i32
    %c0_i32_0 = arith.constant 0 : i32
    %c0_i32_1 = arith.constant 0 : i32
    return %c0_i32, %c0_i32_0 : i32, i32
  }
  func.func @transform_2(%arg0: i32, %arg1: i32) -> (i32, i32, i32) {
    %c0_i32 = arith.constant 0 : i32
    %c0_i32_0 = arith.constant 0 : i32
    %c0_i32_1 = arith.constant 0 : i32
    return %arg0, %c0_i32, %c0_i32_0 : i32, i32, i32
  }
  func.func @transform_3(%arg0: i32, %arg1: i32) -> (i32, i32, i32) {
    %c0_i32 = arith.constant 0 : i32
    %c0_i32_0 = arith.constant 0 : i32
    %c0_i32_1 = arith.constant 0 : i32
    return %arg0, %c0_i32, %c0_i32_0 : i32, i32, i32
  }
}

</mosaic_0001>

<bundles_post_ra>
// kernel: tpu_custom_call.1
= control target key start
LH: loop header
LB: loop body
LE: loop exit
PB: predicated region body
PF: predicated region fallthrough
CT: control target
= control target key end

     0   :  { %s1077_s0 = inlined_call_operand.hbm [shape: bf16[2,4,16,64], index: 0, kind: input, shape index: {}]   ;;  %s1078_s1 = inlined_call_operand.hbm [shape: bf16[10,16], index: 1, kind: input, shape index: {}]   ;;  %s1079_s2 = inlined_call_operand.hbm [shape: bf16[2,2,64], index: 2, kind: output, shape index: {0}]   ;;  %s1080_s3 = inlined_call_operand.hbm [shape: bf16[2,8,64], index: 3, kind: output, shape index: {1}]  }
   0x1   :  { %1092 = sst [smem:[#allocation21_spill]] %s1078_s1 }
   0x2   :  { %1093 = sst [smem:[#allocation22_spill]] %s1079_s2 }
   0x3   :  { %1094 = sst [smem:[#allocation23_spill]] %s1080_s3 }
   0x4   :  { %9 = vsyncpa [#allocation4], 0 }
   0x5   :  { %11 = vsyncpa [#allocation4 + $0x1], 0 }
   0x6   :  { %12 = vsyncpa [#allocation7], 0 }
   0x7   :  { %13 = vsyncpa [#allocation5], 0 }
   0x8   :  { %15 = vsyncpa [#allocation5 + $0x1], 0 }
   0x9   :  { %16 = vsyncpa [#allocation10], 0 }
   0xa   :  { %18 = vsyncpa [#allocation10 + $0x1], 0  ;;  %s849_s12 = smov 0   ;;  %s851_s13 = smov 0  }
   0xb   :  { %s853_s14 = smov 0   ;;  %s855_s15 = smov 0  }
   0xc   :  { %s857_s16 = smov 0   ;;  %s859_s17 = smov 0  }
   0xd   :  { %s861_s18 = smov 0   ;;  %s863_s19 = smov 0  }
   0xe   :  { %s865_s20 = smov 0   ;;  %s867_s21 = smov 0  }
   0xf   :  { %s869_s22 = smov 0  }
  0x10 LB: > { %1095 = sst [smem:[#allocation15_spill]] %s784_s12  ;;  %s455_s23 = sadd.s32 4294967295, %s824_s22   ;;  %s824_s22 = sphi %s869_s22, %s24_s22   ;;  %s820_s21 = sphi %s867_s21, %s1127_s21   ;;  %s816_s20 = sphi %s865_s20, %s1126_s20   ;;  %s812_s19 = sphi %s863_s19, %s1125_s19   ;;  %s808_s18 = sphi %s861_s18, %s1124_s18   ;;  %s804_s17 = sphi %s859_s17, %s1123_s17   ;;  %s800_s16 = sphi %s857_s16, %s1122_s16   ;;  %s796_s15 = sphi %s855_s15, %s1121_s15   ;;  %s792_s14 = sphi %s853_s14, %s1120_s14   ;;  %s788_s13 = sphi %s851_s13, %s1119_s13   ;;  %s784_s12 = sphi %s849_s12, %s1118_s12  }
  0x11   : > { %1096 = sst [smem:[#allocation16_spill]] %s812_s19  ;;  %s456_s24 = sadd.s32 4294967294, %s824_s22  }
  0x12   : > { %p58_p0 = scmp.ne.s32.totalorder %s800_s16, %s796_s15  ;;  %p905_p1 = scmp.eq.s32.totalorder %s455_s23, 0 }
  0x13   : > { %p102_p2 = scmp.ne.s32.totalorder %s792_s14, %s788_s13  ;;  %p103_p3 = scmp.eq.s32.totalorder %s455_s23, 7 }
  0x14   : > { %p913_p4 = por %p905_p1, %p58_p0  ;;  %p108_p5 = scmp.ne.s32.totalorder %s788_s13, %s784_s12 }
  0x15   : > { %p919_p6 = por %p103_p3, %p102_p2  ;;  %p109_p7 = scmp.eq.s32.totalorder %s456_s24, 7 }
  0x16   : > { %p457_p8 = scmp.ge.s32.totalorder %s824_s22, 1  ;;  %p142_p9 = scmp.lt.s32.totalorder %s824_s22, 9 }
  0x17   : > { %s1099_s27 = scalar_select %p919_p6, 1, 0 }
  0x18   : > { %p925_p10 = por %p109_p7, %p108_p5  ;;  %p929_p11 = pnand %p457_p8, %p142_p9 }
  0x19   : > { %1100 = sst [smem:[#allocation17_spill]] %s1099_s27  ;;  %s826_s6 = smov [#allocation6]  }
  0x1a   : > { %s1101_s28 = scalar_select %p925_p10, 1, 0 }
  0x1b   : > { %s1104_s1 = sld [smem:[#allocation21_spill]]  ;;  %p496_p12 = pneg %p929_p11 }
  0x1c   : > { %1102 = sst [smem:[#allocation18_spill]] %s1101_s28  ;;  %s155_s7 = sshll.u32 %s826_s6, 4  ;;  %s156_s7 = int_to_ptr.vmem [resolvable:$true] %s155_s7 }
  0x1d   : > { %p497_p13 = pnand %p496_p12, %p905_p1  ;;  %s1081_s8 = smov 64  }
  0x1e   : > { %s1082_s9 = smov 4   ;;  %s33_s10 = sadd.s32 1, %s816_s20 }
  0x1f   : > { %p34_p0 = scmp.ge.s32.totalorder %s33_s10, 4  ;;  %s36_s11 = sadd.s32 1, %s820_s21 }
  0x20   : > { %p52_p2 = scmp.ne.s32.totalorder %s804_s17, %s800_s16  ;;  %p53_p3 = scmp.eq.s32.totalorder %s824_s22, 0 }
  0x21   : > { %s153_s5 = sshll.u32 %s1104_s1, 4  ;;  %s1129_s10 = smov (%p34_p0, %s33_s10), 0  ;;  %s154_s5 = int_to_ptr.hbm [resolvable:$true] %s153_s5 }
  0x22   : > { %499 = dma.hbm_to_vmem [thread:$0]  (!%p497_p13), %s154_s5, 128, %s156_s7, [#allocation7], %s1081_s8, %s1081_s8, %s1082_s9  }
  0x23   : > { %1105 = sst [smem:[#allocation19_spill]] %s1129_s10  ;;  %s1131_s11 = smov (!%p34_p0, %s36_s11), %s820_s21 }
  0x24   : > { %s41_s15 = ssub.s32 %s816_s20, %s1129_s10  ;;  %s45_s23 = sadd.s32 1, %s804_s17 }
  0x25   : > { %p38_p5 = scmp.ge.s32.totalorder %s1131_s11, 2  ;;  %p954_p7 = por %p53_p3, %p52_p2 }
  0x26   : > { %s92_s30 = sadd.s32 1, %s792_s14  ;;  %s169_s4 = sand.u32 1, %s804_s17  }
  0x27   : > { %s1133_s11 = smov (%p38_p5, %s1131_s11), 0  ;;  %p512_p8 = scmp.lt.s32.totalorder %s824_s22, 8 }
  0x28   : > { %1107 = sst [smem:[#allocation20_spill]] %s1133_s11  ;;  %s460_s5 = sshll.u32 %s169_s4, 3 }
  0x29   : > { %s40_s6 = ssub.s32 %s820_s21, %s1133_s11  ;;  %s461_s8 = sshll.u32 %s816_s20, 1 }
  0x2a   : > { %s42_s7 = sor.u32 %s41_s15, %s40_s6  ;;  %p90_p9 = scmp.eq.s32.totalorder %s40_s6, 0 }
  0x2b   : > { %p43_p12 = scmp.eq.s32.totalorder %s42_s7, 0  ;;  %s462_s10 = sshll.u32 %s820_s21, 3 }
  0x2c   : > { %s967_s9 = scalar_select %p90_p9, %s792_s14, %s92_s30  }
  0x2d   : > { %s970_s1 = scalar_select %p43_p12, %s804_s17, %s45_s23  }
  0x2e   : > { %s173_s28 = scalar_lea.vmem [#allocation3], %s460_s5  ;;  %s178_s3 = sadd.s32 %s462_s10, %s461_s8 }
  0x2f   : > { %s183_s12 = sshll.u32 %s173_s28, 4  ;;  %s463_s27 = sshll.u32 %s178_s3, 2  ;;  %s184_s12 = int_to_ptr.vmem [resolvable:$true] %s183_s12 }
  0x30   : > { %p501_p13 = pnand %p512_p8, %p954_p7  ;;  %s180_s11 = scalar_lea.hbm %s1077_s0, %s463_s27 }
  0x31   : > { %s181_s15 = sshll.u32 %s180_s11, 4  ;;  %s170_s6 = scalar_lea.sflag [#allocation4], %s169_s4  ;;  %s182_s15 = int_to_ptr.hbm [resolvable:$true] %s181_s15 }
  0x32   : > { %s1108_s30 = smov 4   ;;  %s1109_s7 = smov 64  }
  0x33   : > { %503 = dma.hbm_to_vmem [thread:$0]  (!%p501_p13), %s182_s15, 128, %s184_s12, %s170_s6, %s1109_s7, %s1109_s7, %s1108_s30  }
  0x34   : > { %195 = sbr.rel (%p929_p11) target bundleno = 266 (0x10a), region = 28  ;;  %s197_s3 = sand.u32 (!%p929_p11), 1, %s800_s16  }
  0x35   : > { %s465_s28 = sshll.u32 (!%p929_p11), %s197_s3, 3  ;;  %s198_s8 = scalar_lea.sflag (!%p929_p11), [#allocation4], %s197_s3 }
  0x36   : > { %s201_s10 = scalar_lea.vmem (!%p929_p11), [#allocation3], %s465_s28 }
  0x39   : > { %767 = dma.done.wait (%p913_p4), %s198_s8, 128  }
  0x3a   : > { %769 = vsyncadd (%p913_p4), %s198_s8, 4294967168 }
  0x3b   : > { %771 = dma.done.wait (%p905_p1), [#allocation7], 128  }
  0x3c   : > { %773 = vsyncadd (%p905_p1), [#allocation7], 4294967168  ;;  %s995_s2 = sand.u32 1, %s788_s13   ;;  %v485_v0 = vld [vmem:[%s201_s10] sm:$0xff]  ;;  %v470_v1 = vld [vmem:[#allocation6] sm:$0xf] }
  0x3d   : > { %s467_s12 = sshll.u32 %s995_s2, 2  ;;  %v484_v2 = vld [vmem:[#allocation6] sm:$0x10]  ;;  %261 = vmatpush.bf16.msra.mxu0 %v485_v0  ;;  %vm250_vm0 = vcmask 130048   ;;  %s226_s19 = scalar_lea.vmem [#allocation8], %s995_s2 }
  0x3e   : > { %v471_v3 = vor.u32 %v484_v2, %v470_v1  ;;  %s999_s26 = scalar_lea.vmem [#allocation9], %s467_s12  ;;  %p477_p1 = scmp.ne.s32.totalorder %s808_s18, 0 }
  0x40   : > { %476 = vmatmul.msk.bf16.vlgmr.msra.gmra.mxu0 %vm250_vm0, %v471_v3 }
  0xbd   : > { %v263_v4 = vpop.f32.mrf.mxu0 }
  0xc1   : > { %271 = sbr.rel (%p477_p1) target bundleno = 201 (0xc9), region = 40 }
  0xc5   : > { %v265_v5 = vpop.f32.mrf.mxu0 }
  0xc6   : > { %vm272_vm1 = vcmask 523264   ;;  %vm274_vm2 = vcmask 517120  }
  0xc7   : > { %273 = vst.msk [vmem:[#allocation2] sm:$0xff] %vm272_vm1, %v263_v4 }
  0xc8   : > { %275 = vst.msk [vmem:[#allocation2 + $0x8] sm:$0x3] %vm274_vm2, %v265_v5 }
  0xc9 PF: > { %p478_p4 = scmp.le.s32.totalorder %s808_s18, 0 }
  0xcb   : > { %279 = sbr.rel (%p478_p4) target bundleno = 213 (0xd5), region = 44 }
  0xd0   : > { %v280_v6 = vld [vmem:[#allocation2] sm:$0xff]  ;;  %vm284_vm3 = vcmask 523264   ;;  %v281_v7 = vld [vmem:[#allocation2 + $0x8] sm:$0x3]  ;;  %vm286_vm4 = vcmask 517120  }
  0xd1   : > { %v282_v8 = vmax.f32 %v280_v6, %v263_v4  ;;  %v283_v9 = vmax.f32 %v281_v7, %v265_v5 }
  0xd3   : > { %285 = vst.msk [vmem:[#allocation2] sm:$0xff] %vm284_vm3, %v282_v8 }
  0xd4   : > { %287 = vst.msk [vmem:[#allocation2 + $0x8] sm:$0x3] %vm286_vm4, %v283_v9 }
  0xd5 PF: > { %p479_p11 = scmp.ne.s32.totalorder %s808_s18, 3 }
  0xd7   : > { %291 = sbr.rel (%p479_p11) target bundleno = 225 (0xe1), region = 48 }
  0xdc   : > { %v292_v10 = vld [vmem:[#allocation2] sm:$0x3]  ;;  %vm294_vm5 = vcmask 516096   ;;  %v296_v11 = vld [vmem:[#allocation2 + $0x2] sm:$0xff]  ;;  %vm298_vm6 = vcmask 519168  }
  0xdd   : > { %v293_v12 = vpack.c.bf16 %v292_v10, %v292_v10  ;;  %v297_v13 = vpack.c.bf16 %v296_v11, %v296_v11 }
  0xdf   : > { %295 = vst.msk [vmem:[%s226_s19] sm:$0x1] %vm294_vm5, %v293_v12 }
  0xe0   : > { %299 = vst.msk [vmem:[%s999_s26] sm:$0xf] %vm298_vm6, %v297_v13 }
  0xe1 PF: > { %s1110_s25 = sld [smem:[#allocation16_spill]]  ;;  %s316_s24 = sshll.u32 %s226_s19, 4  ;;  %s317_s24 = int_to_ptr.vmem [resolvable:$true] %s316_s24 }
  0xe2   : > { %s1111_s11 = sld [smem:[#allocation22_spill]]  ;;  %s301_s5 = scalar_lea.sflag [#allocation5], %s995_s2 }
  0xe8   : > { %s314_s23 = scalar_lea.hbm %s1111_s11, %s1110_s25  ;;  %s686_s3 = scalar_lea.hbm %s1111_s11, 2 }
  0xe9   : > { %s318_s4 = sshll.u32 %s314_s23, 4  ;;  %s319_s4 = int_to_ptr.hbm [resolvable:$true] %s318_s4 }
  0xea   : > { %s680_s15 = sshra.s32 %s319_s4, 4  ;;  %s681_s15 = int_to_ptr.hbm [resolvable:$true] %s680_s15 }
  0xeb   : > { %s682_s6 = scalar_lea.hbm %s681_s15, 1  ;;  %p687_p5 = scmp.lt.s32.totalorder %s681_s15, %s1111_s11 }
  0xec   : > { %p683_p0 = scmp.ne.s32.totalorder %s681_s15, %s682_s6  ;;  %p688_p7 = scmp.lt.s32.totalorder %s686_s3, %s682_s6 }
  0xee   : > { %p684_p2 = pnand %p683_p0, %p919_p6  ;;  %p689_p8 = por %p688_p7, %p687_p5 }
  0xf0   : > { %p685_p3 = pneg %p684_p2 }
  0xf2   : > { %p690_p9 = pnand %p689_p8, %p685_p3 }
  0xf4   : > { %693 = shalt.err (!%p690_p9)
}
  0xf5   : > { %492 = dma.vmem_to_hbm [thread:$0]  (%p919_p6), %s317_s24, 16, %s319_s4, %s301_s5  }
  0xf6   : > { %s481_s10 = sshll.u32 %s1110_s25, 2  ;;  %s1113_s27 = sld [smem:[#allocation23_spill]] }
  0xf7   : > { %s330_s23 = sshll.u32 %s999_s26, 4  ;;  %s305_s15 = scalar_lea.sflag [#allocation10], %s995_s2  ;;  %s331_s23 = int_to_ptr.vmem [resolvable:$true] %s330_s23 }
  0xfc   : > { %s328_s29 = scalar_lea.hbm %s1113_s27, %s481_s10  ;;  %s714_s25 = scalar_lea.hbm %s1113_s27, 8 }
  0xfd   : > { %s332_s30 = sshll.u32 %s328_s29, 4  ;;  %s333_s30 = int_to_ptr.hbm [resolvable:$true] %s332_s30 }
  0xfe   : > { %s708_s6 = sshra.s32 %s333_s30, 4  ;;  %s709_s6 = int_to_ptr.hbm [resolvable:$true] %s708_s6 }
  0xff   : > { %s710_s7 = scalar_lea.hbm %s709_s6, 4  ;;  %p715_p4 = scmp.lt.s32.totalorder %s709_s6, %s1113_s27 }
 0x100   : > { %p711_p12 = scmp.ne.s32.totalorder %s709_s6, %s710_s7  ;;  %p716_p11 = scmp.lt.s32.totalorder %s714_s25, %s710_s7 }
 0x102   : > { %p712_p13 = pnand %p711_p12, %p919_p6  ;;  %p717_p0 = por %p716_p11, %p715_p4 }
 0x104   : > { %p713_p1 = pneg %p712_p13 }
 0x106   : > { %p718_p2 = pnand %p717_p0, %p713_p1 }
 0x108   : > { %721 = shalt.err (!%p718_p2)
}
 0x109   : > { %493 = dma.vmem_to_hbm [thread:$0]  (%p919_p6), %s331_s23, 64, %s333_s30, %s305_s15  }
 0x10a PF: > { %s1114_s2 = sld [smem:[#allocation15_spill]]  ;;  %p514_p3 = scmp.ge.s32.totalorder %s824_s22, 2 }
 0x10c   : > { %p505_p5 = pnand %p514_p3, %p925_p10 }
 0x10e   : > { %p506_p7 = pneg %p505_p5 }
 0x110   : > { %s344_s5 = sand.u32 1, %s1114_s2  }
 0x111   : > { %s345_s8 = scalar_lea.sflag [#allocation5], %s344_s5 }
 0x112   : > { %775 = dma.done.wait (%p506_p7), %s345_s8, 16  }
 0x113   : > { %777 = vsyncadd (%p506_p7), %s345_s8, 4294967280  ;;  %s354_s10 = scalar_lea.sflag [#allocation10], %s344_s5 }
 0x114   : > { %779 = dma.done.wait (%p506_p7), %s354_s10, 64  }
 0x115   : > { %781 = vsyncadd (%p506_p7), %s354_s10, 4294967232  ;;  %s24_s22 = sadd.s32 1, %s824_s22   ;;  %s1116_s29 = sld [smem:[#allocation19_spill]] }
 0x116   : > { %p21_p8 = scmp.ge.s32.totalorder %s24_s22, 10   ;;  %s1117_s23 = sld [smem:[#allocation20_spill]] }
 0x117   : > { %s1118_s12 = smov %s788_s13  ;;  %s1119_s13 = smov %s792_s14 }
 0x118   : > { %s1120_s14 = smov %s967_s9  ;;  %s1121_s15 = smov %s800_s16 }
 0x119   : > { %s1122_s16 = smov %s804_s17  ;;  %s1123_s17 = smov %s970_s1 }
 0x11a   : > { %s1124_s18 = smov %s816_s20  ;;  %s1125_s19 = smov %s820_s21 }
 0x11b   : > { %s1126_s20 = smov %s1116_s29  ;;  %23 = sbr.rel (!%p21_p8) target bundleno = 16 (0x10), region = 106 }
 0x11c   : > { %s1127_s21 = smov %s1117_s23 }
 0x120   :  { %360 = vsyncpa [#allocation4], 1 }
 0x121   :  { %362 = vsyncpa [#allocation4 + $0x1], 1 }
 0x122   :  { %363 = vsyncpa [#allocation7], 1 }
 0x123   :  { %364 = vsyncpa [#allocation5], 1 }
 0x124   :  { %366 = vsyncpa [#allocation5 + $0x1], 1 }
 0x125   :  { %367 = vsyncpa [#allocation10], 1 }
 0x126   :  { %369 = vsyncpa [#allocation10 + $0x1], 1 }

</bundles_post_ra>
